<compile_context>
chip_gen: v7x
topology: tpu7x:2x2x1
jax: 0.10.0
libtpu: 0.0.40
codegen_flags: <defaults>
</compile_context>

<pallas_src>
import functools
from typing import NamedTuple

import jax
import jax.numpy as jnp
from jax.experimental import pallas as pl
from jax.experimental.pallas import tpu as pltpu


def _round_up(n, m):
    return ((n + m - 1) // m) * m


class WordConvTables(NamedTuple):
    """Weight-derived tables. Build ONCE per weight update, not per forward call."""
    pe: jax.Array        # (V, G*K)   pe[v, g*K+k] = emb[perm_g(v), k]   (fast 1-hot path)
    perms_t: jax.Array   # (V, G*V)   all inverse-permutation matrices side by side
    emb_bd: jax.Array    # (G*V, G*K) block-diagonal kron(I_G, emb)      (argmax path)
    num_groups: int
    vocab_size: int
    emb_size: int


def make_wordconv_tables(perms, emb):
    """perms: (G, V, V) 0/1 permutation matrices; emb: (V, K)."""
    G, V, _ = perms.shape
    K = emb.shape[1]
    # Fold emb into the permutations in f32.  Exact: perms are 0/1 permutation
    # matrices, so each pe row is a bit-exact copy of an emb row even after casting
    # back to emb.dtype.
    pe = jnp.einsum(
        "gvw,wk->vgk", perms.astype(jnp.float32), emb.astype(jnp.float32)
    ).reshape(V, G * K).astype(emb.dtype)
    # Argmax-path tables: [P_0 | ... | P_{G-1}] and kron(I_G, emb).
    perms_t = jnp.transpose(perms, (1, 0, 2)).reshape(V, G * V).astype(jnp.float32)
    emb_bd = jnp.kron(jnp.eye(G, dtype=emb.dtype), emb)  # (G*V, G*K)
    return WordConvTables(pe, perms_t, emb_bd, G, V, K)


# --------------------------------------------------------------------------------------
# Fast path: x strictly one-hot  ->  out = x @ (perms (.) emb), one MXU matmul.
# --------------------------------------------------------------------------------------
def _wordconv_fused_kernel(x_ref, pe_ref, out_ref):
    # x_ref  : (TB, V)     one-hot words
    # pe_ref : (V, G*K)    folded permutation∘embedding table (VMEM-resident)
    # out_ref: (TB, G*K)   lane-dense output slab
    out_ref[...] = jnp.dot(
        x_ref[...], pe_ref[...], preferred_element_type=jnp.float32
    ).astype(out_ref.dtype)


# --------------------------------------------------------------------------------------
# Fallback path: preserves the explicit per-group argmax (valid for soft inputs).
# Exactly two MXU matmuls; the per-group argmax / one-hot rebuild is VPU-only.
# --------------------------------------------------------------------------------------
def _wordconv_argmax_kernel(x_ref, pt_ref, ebd_ref, out_ref, *, vocab, num_groups):
    # x_ref  : (TB, V)
    # pt_ref : (V, G*V)    [P_0 | P_1 | ... | P_{G-1}]
    # ebd_ref: (G*V, G*K)  kron(I_G, emb)
    # out_ref: (TB, G*K)
    x = x_ref[...]
    tb = x.shape[0]
    gv = num_groups * vocab

    # Matmul #1: scores for ALL groups at once -> (TB, G*V).
    scores = jnp.dot(x, pt_ref[...], preferred_element_type=jnp.float32)

    lane = jax.lax.broadcasted_iota(jnp.int32, (tb, gv), 1)
    group = lane // vocab

    # Per-group argmax + one-hot rebuild.  Static unroll over G is VPU-only (select /
    # max / compare on one (TB, G*V) tile) — all MXU matmuls and the concatenate of the
    # old version are gone; tie-break is "first max" to match argmax semantics.
    onehot = jnp.zeros((tb, gv), dtype=jnp.float32)
    neg_inf = jnp.float32(-jnp.inf)
    for g in range(num_groups):
        in_g = group == g
        sg = jnp.where(in_g, scores, neg_inf)
        gmax = jnp.max(sg, axis=-1, keepdims=True)                      # (TB, 1)
        is_max = in_g & (scores == gmax)
        first = jnp.min(jnp.where(is_max, lane, gv), axis=-1, keepdims=True)
        onehot = jnp.where(lane == first, 1.0, onehot)

    # Matmul #2: one-hot gather of all group embeddings -> lane-dense (TB, G*K) slab.
    out_ref[...] = jnp.dot(
        onehot.astype(ebd_ref.dtype), ebd_ref[...],
        preferred_element_type=jnp.float32,
    ).astype(out_ref.dtype)


def wordconv_forward(x, tables, *, strict_one_hot=True, block_b=256):
    """x: (B, V) one-hot float words -> (B, G, K) permuted-embedding lookups.

    strict_one_hot=True assumes x is exactly one-hot (values exactly 1.0), which is the
    documented contract of WordConv.forward; soft / smoothed inputs must use
    strict_one_hot=False (keeps the explicit per-group argmax).
    """
    B, V = x.shape
    assert V == tables.vocab_size
    G, K = tables.num_groups, tables.emb_size
    GK = G * K

    # Batch tiling: TB a multiple of 8 sublanes, large to amortize per-step overhead;
    # the ("parallel",) batch grid shards across both TensorCores on v7x.
    TB = min(_round_up(B, 8), block_b)
    Bp = _round_up(B, TB)
    if Bp != B:
        x = jnp.pad(x, ((0, Bp - B), (0, 0)))
    grid = (Bp // TB,)
    params = pltpu.CompilerParams(dimension_semantics=("parallel",))

    x_spec = pl.BlockSpec((TB, V), lambda i: (i, 0))
    out_spec = pl.BlockSpec((TB, GK), lambda i: (i, 0))
    resident = lambda i: (0, 0)  # weight tables: DMA'd once, VMEM-resident across steps

    if strict_one_hot:
        pe = tables.pe
        cost = pl.CostEstimate(
            flops=2 * Bp * V * GK,
            transcendentals=0,
            bytes_accessed=(x.size * x.dtype.itemsize
                            + pe.size * pe.dtype.itemsize
                            + Bp * GK * pe.dtype.itemsize))
        out_flat = pl.pallas_call(
            _wordconv_fused_kernel,
            out_shape=jax.ShapeDtypeStruct((Bp, GK), pe.dtype),
            grid_spec=pltpu.PrefetchScalarGridSpec(
                num_scalar_prefetch=0,
                grid=grid,
                in_specs=[x_spec, pl.BlockSpec((V, GK), resident)],
                out_specs=out_spec),
            compiler_params=params,
            cost_estimate=cost,
        )(x, pe)
    else:
        pt, ebd = tables.perms_t, tables.emb_bd
        kern = functools.partial(_wordconv_argmax_kernel, vocab=V, num_groups=G)
        cost = pl.CostEstimate(
            flops=2 * Bp * V * (G * V) + 2 * Bp * (G * V) * GK,
            transcendentals=0,
            bytes_accessed=(x.size * x.dtype.itemsize
                            + pt.size * pt.dtype.itemsize
                            + ebd.size * ebd.dtype.itemsize
                            + Bp * GK * ebd.dtype.itemsize))
        out_flat = pl.pallas_call(
            kern,
            out_shape=jax.ShapeDtypeStruct((Bp, GK), ebd.dtype),
            grid_spec=pltpu.PrefetchScalarGridSpec(
                num_scalar_prefetch=0,
                grid=grid,
                in_specs=[x_spec,
                          pl.BlockSpec((V, G * V), resident),
                          pl.BlockSpec((G * V, GK), resident)],
                out_specs=out_spec),
            compiler_params=params,
            cost_estimate=cost,
        )(x, pt, ebd)

    # (Bp, G*K) -> slice off batch padding -> contiguous (free) reshape to (B, G, K),
    # matching torch's B x |G| x K.
    return out_flat[:B].reshape(B, G, K)


def _reference(x, perms, emb):
    # pure-JAX replica of the torch forward for verification
    scores = jnp.einsum("bv,gvw->bgw", x, perms)  # B x G x V
    idx = jnp.argmax(scores, axis=-1)             # B x G
    return emb[idx]                               # B x G x K


if __name__ == "__main__":
    key = jax.random.PRNGKey(0)
    k_emb, k_word = jax.random.split(key)

    B, V, K, G = 8, 16, 32, 4  # batch, vocabulary, embedding size, |symmetry group|
    # NB: G * K = 128 -> exactly one vreg lane width for the output slab.

    # symmetry group: cyclic shifts -> index2inverse[i] is a V x V permutation matrix
    eye = jnp.eye(V, dtype=jnp.float32)
    perms = jnp.stack([eye[(jnp.arange(V) + i) % V] for i in range(G)], axis=0)  # (G,V,V)

    # nn.Embedding(V, K) weight ~ N(0, 1)
    emb = jax.random.normal(k_emb, (V, K), dtype=jnp.float32)

    # one-hot input words, B x V
    word_ids = jax.random.randint(k_word, (B,), 0, V)
    x = jax.nn.one_hot(word_ids, V, dtype=jnp.float32)

    # Weight-derived tables are built ONCE (per weight update), outside the hot path.
    tables = make_wordconv_tables(perms, emb)

    ref = _reference(x, perms, emb)

    # default fast path (fused single matmul — exact for one-hot input)
    out = jax.block_until_ready(wordconv_forward(x, tables))
    assert out.shape == (B, G, K)
    assert jnp.allclose(out, ref, atol=1e-6), "fused path mismatch vs reference"

    # argmax-preserving fallback path (two matmuls, VPU-only per-group argmax)
    out2 = jax.block_until_ready(wordconv_forward(x, tables, strict_one_hot=False))
    assert out2.shape == (B, G, K)
    assert jnp.allclose(out2, ref, atol=1e-6), "argmax path mismatch vs reference"

    print("KERNEL_OK")
</pallas_src>

<mosaic_0001>
module attributes {stable_mosaic.version = 11 : i64} {
  func.func @_wordconv_fused_kernel(%arg0: i32, %arg1: memref<8x16xf32, #tpu.memory_space<vmem>>, %arg2: memref<16x128xf32, #tpu.memory_space<vmem>>, %arg3: memref<8x128xf32, #tpu.memory_space<vmem>>) attributes {dimension_semantics = [#tpu.dimension_semantics<parallel>], iteration_bounds = array<i64: 1>, scalar_prefetch = 0 : i64, scratch_operands = 0 : i64, tpu.core_type = #tpu.core_type<tc>, window_params = [{transform_indices = @transform_0, window_bounds = array<i64: 8, 16>}, {pipeline_mode = #tpu.pipeline_mode<synchronous>, transform_indices = @transform_1, window_bounds = array<i64: 16, 128>}, {transform_indices = @transform_2, window_bounds = array<i64: 8, 128>}]} {
    %c0 = arith.constant 0 : index
    %c0_0 = arith.constant 0 : index
    %0 = vector.load %arg1[%c0, %c0_0] : memref<8x16xf32, #tpu.memory_space<vmem>>, vector<8x16xf32>
    %c0_1 = arith.constant 0 : index
    %c0_2 = arith.constant 0 : index
    %1 = vector.load %arg2[%c0_1, %c0_2] : memref<16x128xf32, #tpu.memory_space<vmem>>, vector<16x128xf32>
    %cst = arith.constant dense<0.000000e+00> : vector<8x128xf32>
    %2 = tpu.matmul %0, %1, %cst {dimension_numbers = #tpu.dot_dimension_numbers<[1], [0], [0], [1], [0, 0, 1, 1], [], []>} : vector<8x16xf32>, vector<16x128xf32>, vector<8x128xf32> -> vector<8x128xf32>
    %c0_3 = arith.constant 0 : index
    %c0_4 = arith.constant 0 : index
    %3 = vector.load %arg3[%c0_3, %c0_4] : memref<8x128xf32, #tpu.memory_space<vmem>>, vector<8x128xf32>
    tpu.vector_store %arg3[%c0_3, %c0_4], %2 {strides = array<i32>} : memref<8x128xf32, #tpu.memory_space<vmem>>, vector<8x128xf32>,
    return
  }
  func.func @transform_0(%arg0: i32) -> (i32, i32) {
    %c0_i32 = arith.constant 0 : i32
    %c0_i32_0 = arith.constant 0 : i32
    return %arg0, %c0_i32 : i32, i32
  }
  func.func @transform_1(%arg0: i32) -> (i32, i32) {
    %c0_i32 = arith.constant 0 : i32
    %c0_i32_0 = arith.constant 0 : i32
    %c0_i32_1 = arith.constant 0 : i32
    return %c0_i32, %c0_i32_0 : i32, i32
  }
  func.func @transform_2(%arg0: i32) -> (i32, i32) {
    %c0_i32 = arith.constant 0 : i32
    %c0_i32_0 = arith.constant 0 : i32
    return %arg0, %c0_i32 : i32, i32
  }
}

</mosaic_0001>

<bundles_post_ra>
// kernel: tpu_custom_call.1
= control target key start
LH: loop header
LB: loop body
LE: loop exit
PB: predicated region body
PF: predicated region fallthrough
CT: control target
= control target key end

     0   :  { %7 = vsyncpa [#allocation3], 0  ;;  %s292_s0 = inlined_call_operand.hbm [shape: f32[8,16], index: 0, kind: input, shape index: {}]   ;;  %s293_s1 = inlined_call_operand.hbm [shape: f32[16,128], index: 1, kind: input, shape index: {}]   ;;  %s294_s2 = inlined_call_operand.hbm [shape: f32[8,128], index: 2, kind: output, shape index: {}]  }
   0x1   :  { %8 = vsyncpa [#allocation6], 0 }
   0x2   :  { %9 = vsyncpa [#allocation4], 0  ;;  %s226_s9 = smov [#allocation2]   ;;  %s227_s11 = smov [#allocation5]  }
   0x3   :  { %s16_s10 = sshll.u32 %s226_s9, 4  ;;  %s25_s12 = sshll.u32 %s227_s11, 4  ;;  %s17_s10 = int_to_ptr.vmem [resolvable:$true] %s16_s10  ;;  %s249_s12 = int_to_ptr.vmem [resolvable:$true] %s25_s12 }
   0x4   :  { %s154_s15 = scalar_lea.hbm %s292_s0, 128 }
   0x5   :  { %p155_p0 = scmp.ne.s32.totalorder %s292_s0, %s154_s15  ;;  %p158_p1 = scmp.lt.u32.totalorder %s154_s15, %s292_s0 }
   0x7   :  { %p160_p2 = pnand %p158_p1, %p155_p0 }
   0x9   :  { %163 = shalt.err (!%p160_p2)
}
   0xa   :  { %s164_s20 = scalar_lea.vmem %s17_s10, 128  ;;  %p169_p4 = scmp.lt.s32.totalorder %s17_s10, %s17_s10 }
   0xb   :  { %p165_p3 = scmp.ne.s32.totalorder %s17_s10, %s164_s20  ;;  %p170_p5 = scmp.lt.s32.totalorder %s164_s20, %s164_s20 }
   0xd   :  { %p171_p6 = por %p170_p5, %p169_p4 }
   0xf   :  { %p172_p7 = pnand %p171_p6, %p165_p3 }
  0x11   :  { %175 = shalt.err (!%p172_p7)
}
  0x12   :  { %19 = dma.hbm_to_vmem [thread:$0]  %s292_s0, 128, %s17_s10, [#allocation3]  }
  0x13   :  { %s176_s25 = scalar_lea.hbm %s293_s1, 256 }
  0x14   :  { %p177_p8 = scmp.ne.s32.totalorder %s293_s1, %s176_s25  ;;  %p180_p9 = scmp.lt.u32.totalorder %s176_s25, %s293_s1 }
  0x16   :  { %p182_p10 = pnand %p180_p9, %p177_p8 }
  0x18   :  { %185 = shalt.err (!%p182_p10)
}
  0x19   :  { %s186_s30 = scalar_lea.vmem %s249_s12, 256  ;;  %p191_p12 = scmp.lt.s32.totalorder %s249_s12, %s249_s12 }
  0x1a   :  { %p187_p11 = scmp.ne.s32.totalorder %s249_s12, %s186_s30  ;;  %p192_p13 = scmp.lt.s32.totalorder %s186_s30, %s186_s30 }
  0x1c   :  { %p193_p0 = por %p192_p13, %p191_p12 }
  0x1e   :  { %p194_p1 = pnand %p193_p0, %p187_p11 }
  0x20   :  { %197 = shalt.err (!%p194_p1)
}
  0x21   :  { %s228_s0 = smov 128   ;;  %s229_s3 = smov 8  }
  0x22   :  { %31 = dma.hbm_to_vmem [thread:$0]  %s293_s1, 256, %s249_s12, [#allocation6], %s228_s0, %s228_s0, %s229_s3  }
  0x23   :  { %220 = dma.done.wait [#allocation3], 128  }
  0x24   :  { %221 = vsyncadd [#allocation3], 4294967168 }
  0x25   :  { %222 = dma.done.wait [#allocation6], 256  }
  0x26   :  { %223 = vsyncadd [#allocation6], 4294967040  ;;  %v230_v0 = vmov 0.0|0.0   ;;  %vm231_vm0 = vmmov 0   ;;  %v232_v1 = vmov 0.0   ;;  %v39_v2 = vld [vmem:[#allocation5] sm:$0xff] }
  0x27   :  { %143 = vmatprep.subr.bf16.mxu0 %v230_v0  ;;  %140 = vmatprep.mubr.msk.f32.mxu0 %vm231_vm0, %v232_v1  ;;  %v40_v3 = vld [vmem:[#allocation5 + $0x8] sm:$0xff]  ;;  %v38_v5 = vld [vmem:[#allocation2] sm:$0xff]  ;;  %vm41_vm1 = vcmask 130048   ;;  %s233_s6 = smov [#allocation7]  }
  0x28   :  { %v144_v4 = vpack.c.bf16 %v40_v3, %v39_v2  ;;  %s122_s7 = sshll.u32 %s233_s6, 4  ;;  %s123_s7 = int_to_ptr.vmem [resolvable:$true] %s122_s7 }
  0x29   :  { %s198_s1 = scalar_lea.vmem %s123_s7, 128  ;;  %p203_p3 = scmp.lt.s32.totalorder %s123_s7, %s123_s7 }
  0x2a   :  { %145 = vmatpush3.bf16.msra.mxu0 %v144_v4  ;;  %p199_p2 = scmp.ne.s32.totalorder %s123_s7, %s198_s1  ;;  %p204_p4 = scmp.lt.s32.totalorder %s198_s1, %s198_s1 }
  0x2c   :  { %p205_p5 = por %p204_p4, %p203_p3 }
  0x2d   :  { %141 = vmatmul.mubr.msk.f32.vlgmr.msra.gmra.mrb[0].mxu0 %vm41_vm1, %v38_v5 }
  0x2e   :  { %p206_p6 = pnand %p205_p5, %p199_p2 }
 0x100   :  { %v111_v6 = vpop.f32.mrb[0].mxu0 }
 0x101   :  { %115 = vst [vmem:[#allocation7] sm:$0xff] %v111_v6  ;;  %v142_v7 = vpop.f32.mrb[1].mxu0 }
 0x102   :  { %209 = shalt.err (!%p206_p6)
}
 0x103   :  { %s210_s10 = scalar_lea.hbm %s294_s2, 128 }
 0x104   :  { %p211_p7 = scmp.ne.s32.totalorder %s294_s2, %s210_s10  ;;  %p214_p8 = scmp.lt.u32.totalorder %s210_s10, %s294_s2 }
 0x106   :  { %p216_p9 = pnand %p214_p8, %p211_p7 }
 0x108   :  { %219 = shalt.err (!%p216_p9)
}
 0x109   :  { %125 = dma.vmem_to_hbm [thread:$0]  %s123_s7, 128, %s294_s2, [#allocation4]  }
 0x10a   :  { %224 = dma.done.wait [#allocation4], 128  }
 0x10b   :  { %225 = vsyncadd [#allocation4], 4294967168 }
 0x10c   :  { %129 = vsyncpa [#allocation3], 1 }
 0x10d   :  { %130 = vsyncpa [#allocation6], 1 }
 0x10e   :  { %131 = vsyncpa [#allocation4], 1 }

</bundles_post_ra>
